<compile_context>
chip_gen: v7x
topology: tpu7x:2x2x1
jax: 0.10.0
libtpu: 0.0.40
codegen_flags: <defaults>
</compile_context>

<pallas_src>
import functools

import jax
import jax.numpy as jnp
import numpy as np
from jax.experimental import pallas as pl
from jax.experimental.pallas import tpu as pltpu

QMAX = 127.0                       # INT8: 2**(8-1) - 1
_MIB = 1024 * 1024
_TILED_VMEM_LIMIT = 32 * _MIB      # 4 MiB blocks x (in+out) x double-buffer = 16 MiB


def _chip_vmem_bytes():
    """Physical VMEM bytes, or 0 if it cannot be queried (be conservative)."""
    try:
        return int(pltpu.get_tpu_info().vmem_capacity_bytes)
    except Exception:
        return 0


def _fast_path_config():
    """Returns (max f32 working-set bytes for the fused path, its vmem limit)."""
    vmem = _chip_vmem_bytes()
    if vmem >= 100 * _MIB:           # v5e / v6e: 128 MiB VMEM, one TensorCore
        return 8 * _MIB, 64 * _MIB   # fused path saves a full HBM pass (3N -> 2N)
    # v7x (64 MiB VMEM, 2 TCs -> tiled 'parallel' grid uses both) or unknown.
    return 2 * _MIB, 32 * _MIB


def _fused_kernel(x_ref, o_ref):
    """Whole-array fast path: amax reduce + fake-quant + ReLU in one block."""
    x = x_ref[...].astype(jnp.float32)
    amax = jnp.max(jnp.abs(x))               # == max(max(x),0,-min(x)) exactly
    scale = amax / QMAX
    inv_scale = QMAX / amax                  # hoisted: per-element multiply only
    q = jnp.round(jnp.clip(x * inv_scale, -QMAX, QMAX))   # round-half-even
    o_ref[...] = jnp.maximum(scale * q, 0.0).astype(o_ref.dtype)


def _amax_reduce_kernel(x_ref, o_ref, *, total_rows, block_rows):
    """Pass 1: per-tile max(|x|), reduced only across sublane groups."""
    absx = jnp.abs(x_ref[...].astype(jnp.float32))         # (block_rows, 128)
    if total_rows % block_rows != 0:
        # A ragged boundary block exists: mask out-of-range rows (0 is neutral).
        row_ids = jax.lax.broadcasted_iota(jnp.int32, absx.shape, 0)
        valid = pl.program_id(0) * block_rows + row_ids < total_rows
        absx = jnp.where(valid, absx, 0.0)
    # Pure-VALU reduce to an (8, 128) vreg; final reduce happens in plain JAX.
    o_ref[...] = jnp.max(absx.reshape(-1, 8, 128), axis=0)[None]


def _apply_kernel(scales_ref, x_ref, o_ref):
    """Pass 2: elementwise fake-quantize + ReLU; scale & 1/scale from SMEM."""
    scale = scales_ref[0]
    inv_scale = scales_ref[1]
    x = x_ref[...].astype(jnp.float32)
    q = jnp.round(jnp.clip(x * inv_scale, -QMAX, QMAX))
    o_ref[...] = jnp.maximum(scale * q, 0.0).astype(o_ref.dtype)


def qrelu_forward(x, *, block_rows=8192):
    """QReLU.forward for quant_type='INT', num_bits=8, fresh qi buffers."""
    assert block_rows % 8 == 0
    orig_shape = x.shape
    orig_dtype = x.dtype
    n = x.size
    flat = x.reshape(-1)                         # metadata-only reshape

    # TODO(synk): n % 128 != 0 still takes a pad + final-slice copy; large
    # activations are essentially always 128-aligned so this path stays cold.
    pad = (-n) % 128
    if pad:
        flat = jnp.pad(flat, (0, pad))           # zeros are neutral for max(|x|)
    x2d = flat.reshape(-1, 128)                  # lane-dense slab (free reshape)
    rows = x2d.shape[0]

    itemsize = jnp.dtype(orig_dtype).itemsize
    f32_bytes = rows * 128 * 4                   # in-kernel f32 working set
    fast_max_bytes, fast_vmem = _fast_path_config()

    if f32_bytes <= fast_max_bytes:
        # --- single fused block: 2 HBM passes (read + write) ---
        out2d = pl.pallas_call(
            _fused_kernel,
            out_shape=jax.ShapeDtypeStruct((rows, 128), orig_dtype),
            in_specs=[pl.BlockSpec((rows, 128), lambda: (0, 0))],
            out_specs=pl.BlockSpec((rows, 128), lambda: (0, 0)),
            compiler_params=pltpu.CompilerParams(vmem_limit_bytes=fast_vmem),
        )(x2d)
    else:
        # --- tiled two-pass pipeline: 3 HBM passes, fully double-buffered ---
        br = min(block_rows, (rows // 8) * 8)    # 8192 rows * 128 * 4B = 4 MiB
        num_tiles = pl.cdiv(rows, br)

        # Pass 1: per-tile max(|x|) -> tiny (num_tiles, 8, 128) output.
        partial = pl.pallas_call(
            functools.partial(_amax_reduce_kernel, total_rows=rows, block_rows=br),
            out_shape=jax.ShapeDtypeStruct((num_tiles, 8, 128), jnp.float32),
            grid=(num_tiles,),
            in_specs=[pl.BlockSpec((br, 128), lambda i: (i, 0))],
            out_specs=pl.BlockSpec((1, 8, 128), lambda i: (i, 0, 0)),
            compiler_params=pltpu.CompilerParams(
                dimension_semantics=("parallel",),
                vmem_limit_bytes=_TILED_VMEM_LIMIT),
            cost_estimate=pl.CostEstimate(
                flops=2 * rows * 128, transcendentals=0,
                bytes_accessed=rows * 128 * itemsize + num_tiles * 8 * 128 * 4),
        )(x2d)

        amax = jnp.max(partial)
        scales = jnp.stack([amax / QMAX, QMAX / amax]).astype(jnp.float32)

        # Pass 2: elementwise apply; scalar scale & inv_scale live in SMEM.
        out2d = pl.pallas_call(
            _apply_kernel,
            out_shape=jax.ShapeDtypeStruct((rows, 128), orig_dtype),
            grid=(num_tiles,),
            in_specs=[pl.BlockSpec(memory_space=pltpu.MemorySpace.SMEM),
                      pl.BlockSpec((br, 128), lambda i: (i, 0))],
            out_specs=pl.BlockSpec((br, 128), lambda i: (i, 0)),
            compiler_params=pltpu.CompilerParams(
                dimension_semantics=("parallel",),
                vmem_limit_bytes=_TILED_VMEM_LIMIT),
            cost_estimate=pl.CostEstimate(
                flops=5 * rows * 128, transcendentals=0,
                bytes_accessed=2 * rows * 128 * itemsize + 8),
        )(scales, x2d)

    out_flat = out2d.reshape(-1)
    if pad:
        out_flat = out_flat[:n]
    return out_flat.reshape(orig_shape)


def _qrelu_reference(x):
    """Pure-JAX reference of the same forward pass (module semantics)."""
    xf = x.astype(jnp.float32)
    max_val = jnp.maximum(jnp.max(xf), 0.0)
    min_val = jnp.minimum(jnp.min(xf), 0.0)
    scale = jnp.maximum(jnp.abs(max_val), jnp.abs(min_val)) / QMAX
    q = jnp.round(jnp.clip(xf / scale, -QMAX, QMAX))
    return jnp.maximum(scale * q, 0.0).astype(x.dtype)


def _check(name, out, ref, x):
    out64 = np.asarray(out, dtype=np.float64)
    ref64 = np.asarray(ref, dtype=np.float64)
    amax = float(np.max(np.abs(np.asarray(x, dtype=np.float64))))
    lsb = (amax / QMAX) if amax > 0 else 1.0
    diff = np.abs(out64 - ref64)
    # The kernel multiplies by 1/scale while the reference divides; at exact .5
    # rounding ties they may land one quantization step apart.  Allow <= 1 LSB
    # everywhere and require near-exact agreement on all but a tiny fraction.
    assert np.all(diff <= lsb * (1.0 + 1e-5) + 1e-7), (name, float(diff.max()))
    frac = float(np.mean(diff > lsb * 1e-3))
    assert frac < 1e-3, (name, frac)


if __name__ == "__main__":
    key = jax.random.PRNGKey(0)
    shapes = [
        (2, 4, 16, 16),        # module-sized NCHW activation, fused fast path
        (2, 3, 5, 7),          # tiny, unaligned (n % 128 != 0)
        (4, 16, 128, 128),     # mid-size activation
        (4, 8193, 128),        # large, tiled path with ragged boundary block
        (1031, 2063),          # large, n % 128 != 0 (pad fallback + tiled)
    ]
    for i, shape in enumerate(shapes):
        xi = jax.random.normal(jax.random.fold_in(key, i), shape,
                               dtype=jnp.float32)
        oi = jax.block_until_ready(qrelu_forward(xi))
        ri = jax.block_until_ready(_qrelu_reference(xi))
        assert oi.shape == xi.shape and oi.dtype == xi.dtype
        _check(str(shape), oi, ri, xi)
    print("KERNEL_OK")
</pallas_src>

<mosaic_0001>
module attributes {stable_mosaic.version = 11 : i64} {
  func.func @_fused_kernel(%arg0: memref<16x128xf32, #tpu.memory_space<vmem>>, %arg1: memref<16x128xf32, #tpu.memory_space<vmem>>) attributes {dimension_semantics = [], scalar_prefetch = 0 : i64, scratch_operands = 0 : i64, tpu.core_type = #tpu.core_type<tc>} {
    %c0 = arith.constant 0 : index
    %c0_0 = arith.constant 0 : index
    %0 = vector.load %arg0[%c0, %c0_0] : memref<16x128xf32, #tpu.memory_space<vmem>>, vector<16x128xf32>
    %1 = math.absf %0 : vector<16x128xf32>
    %2 = vector.shape_cast %1 : vector<16x128xf32> to vector<1x16x128xf32>
    %cst = arith.constant dense<0xFF800000> : vector<1xf32>
    %3 = vector.multi_reduction <maximumf>, %2, %cst [1, 2] : vector<1x16x128xf32> to vector<1xf32>
    %4 = vector.shape_cast %3 : vector<1xf32> to vector<1x1x1xf32>
    %5 = vector.extract %4[0, 0, 0] : f32 from vector<1x1x1xf32>
    %cst_1 = arith.constant 1.270000e+02 : f32
    %6 = arith.divf %5, %cst_1 : f32
    %cst_2 = arith.constant 1.270000e+02 : f32
    %7 = arith.divf %cst_2, %5 : f32
    %8 = vector.broadcast %7 : f32 to vector<16x128xf32>
    %9 = arith.mulf %0, %8 : vector<16x128xf32>
    %cst_3 = arith.constant -1.270000e+02 : f32
    %cst_4 = arith.constant 1.270000e+02 : f32
    %10 = vector.broadcast %cst_3 : f32 to vector<16x128xf32>
    %11 = arith.maximumf %10, %9 : vector<16x128xf32>
    %12 = vector.broadcast %cst_4 : f32 to vector<16x128xf32>
    %13 = arith.minimumf %12, %11 : vector<16x128xf32>
    %14 = math.roundeven %13 : vector<16x128xf32>
    %15 = vector.broadcast %6 : f32 to vector<16x128xf32>
    %16 = arith.mulf %15, %14 : vector<16x128xf32>
    %cst_5 = arith.constant 0.000000e+00 : f32
    %17 = vector.broadcast %cst_5 : f32 to vector<16x128xf32>
    %18 = arith.maximumf %16, %17 : vector<16x128xf32>
    %c0_6 = arith.constant 0 : index
    %c0_7 = arith.constant 0 : index
    %19 = vector.load %arg1[%c0_6, %c0_7] : memref<16x128xf32, #tpu.memory_space<vmem>>, vector<16x128xf32>
    tpu.vector_store %arg1[%c0_6, %c0_7], %18 {strides = array<i32>} : memref<16x128xf32, #tpu.memory_space<vmem>>, vector<16x128xf32>,
    return
  }
}

</mosaic_0001>

<bundles_post_ra>
// kernel: tpu_custom_call.1
= control target key start
LH: loop header
LB: loop body
LE: loop exit
PB: predicated region body
PF: predicated region fallthrough
CT: control target
= control target key end

     0   :  { %6 = vsyncpa [#allocation3], 0  ;;  %s183_s0 = inlined_call_operand.hbm [shape: f32[16,128], index: 0, kind: input, shape index: {}]   ;;  %s184_s1 = inlined_call_operand.hbm [shape: f32[16,128], index: 1, kind: output, shape index: {}]  }
   0x1   :  { %7 = vsyncpa [#allocation4], 0  ;;  %s139_s6 = smov [#allocation2]   ;;  %s91_s10 = scalar_lea.hbm %s183_s0, 256 }
   0x2   :  { %s13_s7 = sshll.u32 %s139_s6, 4  ;;  %p92_p0 = scmp.ne.s32.totalorder %s183_s0, %s91_s10  ;;  %s14_s7 = int_to_ptr.vmem [resolvable:$true] %s13_s7 }
   0x3   :  { %p95_p1 = scmp.lt.u32.totalorder %s91_s10, %s183_s0 }
   0x5   :  { %p97_p2 = pnand %p95_p1, %p92_p0 }
   0x7   :  { %100 = shalt.err (!%p97_p2)
}
   0x8   :  { %s101_s15 = scalar_lea.vmem %s14_s7, 256  ;;  %p106_p4 = scmp.lt.s32.totalorder %s14_s7, %s14_s7 }
   0x9   :  { %p102_p3 = scmp.ne.s32.totalorder %s14_s7, %s101_s15  ;;  %p107_p5 = scmp.lt.s32.totalorder %s101_s15, %s101_s15 }
   0xb   :  { %p108_p6 = por %p107_p5, %p106_p4 }
   0xd   :  { %p109_p7 = pnand %p108_p6, %p102_p3 }
   0xf   :  { %112 = shalt.err (!%p109_p7)
}
  0x10   :  { %s140_s16 = smov 128   ;;  %s141_s17 = smov 8  }
  0x11   :  { %19 = dma.hbm_to_vmem [thread:$0]  %s183_s0, 256, %s14_s7, [#allocation3], %s140_s16, %s140_s16, %s141_s17  }
  0x12   :  { %135 = dma.done.wait [#allocation3], 256  }
  0x13   :  { %136 = vsyncadd [#allocation3], 4294967040  ;;  %v23_v0 = vld [vmem:[#allocation2] sm:$0xff]  ;;  %v24_v1 = vld [vmem:[#allocation2 + $0x8] sm:$0xff]  ;;  %s142_s23 = smov [#allocation5]  }
  0x14   :  { %v25_v2 = vand.u32 2147483647, %v23_v0  ;;  %v26_v3 = vand.u32 2147483647, %v24_v1  ;;  %s65_s24 = sshll.u32 %s142_s23, 4  ;;  %s66_s24 = int_to_ptr.vmem [resolvable:$true] %s65_s24 }
  0x15   :  { %s113_s25 = scalar_lea.vmem %s66_s24, 256  ;;  %p118_p9 = scmp.lt.s32.totalorder %s66_s24, %s66_s24 }
  0x16   :  { %v27_v4 = vmax.f32.f32 %v25_v2, %v26_v3  ;;  %p114_p8 = scmp.ne.s32.totalorder %s66_s24, %s113_s25  ;;  %p119_p10 = scmp.lt.s32.totalorder %s113_s25, %s113_s25 }
  0x18   :  { %28 = vmax.xlane.f32.xlu0 %v27_v4  ;;  %p120_p11 = por %p119_p10, %p118_p9 }
  0x1a   :  { %p121_p12 = pnand %p120_p11, %p114_p8 }
  0xa5   :  { %v29_v5 = vpop.xlane.xlu0 %28 }
  0xa6   :  { %v30_v6 = vrot.slane %v29_v5, 4 }
  0xa8   :  { %v31_v7 = vmax.f32 %v29_v5, %v30_v6 }
  0xaa   :  { %v32_v8 = vrot.slane %v31_v7, 2 }
  0xac   :  { %v33_v9 = vmax.f32 %v31_v7, %v32_v8 }
  0xae   :  { %v34_v10 = vrot.slane %v33_v9, 1 }
  0xb0   :  { %v35_v11 = vmax.f32 %v33_v9, %v34_v10 }
  0xb2   :  { %79 = vpush %v35_v11 }
  0xe3   :  { %s80_s20 = spop %79 }
  0xe4   :  { %v40_v12 = vstv %s80_s20  ;;  %s39_s22 = smul.f32 0.007874016, %s80_s20 }
  0xe5   :  { %89 = vrcp.f32 %v40_v12 }
  0xe6   :  { %v53_v21 = vstv %s39_s22 }
  0xef   :  { %v90_v13 = vpop.eup %89 }
  0xf0   :  { %81 = vpush %v90_v13 }
 0x121   :  { %s82_s0 = spop %81 }
 0x122   :  { %s43_s21 = smul.f32 127.0, %s82_s0 }
 0x124   :  { %v44_v14 = vstv %s43_s21 }
 0x125   :  { %v45_v15 = vmul.f32 %v44_v14, %v23_v0  ;;  %v46_v16 = vmul.f32 %v44_v14, %v24_v1 }
 0x127   :  { %v77_v17 = vclamps-f32 %v45_v15, 127.0  ;;  %v78_v18 = vclamps-f32 %v46_v16, 127.0 }
 0x129   :  { %v83_v19 = vround.rtne.f32 %v77_v17  ;;  %v84_v20 = vround.rtne.f32 %v78_v18 }
 0x12b   :  { %v54_v22 = vmul.f32 %v83_v19, %v53_v21  ;;  %v55_v23 = vmul.f32 %v84_v20, %v53_v21 }
 0x12d   :  { %v56_v24 = vmax.f32 %v54_v22, 0.0  ;;  %v57_v25 = vmax.f32 %v55_v23, 0.0 }
 0x12f   :  { %58 = vst [vmem:[#allocation5] sm:$0xff] %v56_v24  ;;  %59 = vst [vmem:[#allocation5 + $0x8] sm:$0xff] %v57_v25 }
 0x130   :  { %124 = shalt.err (!%p121_p12)
}
 0x131   :  { %s125_s28 = scalar_lea.hbm %s184_s1, 256 }
 0x132   :  { %p126_p13 = scmp.ne.s32.totalorder %s184_s1, %s125_s28  ;;  %p129_p0 = scmp.lt.u32.totalorder %s125_s28, %s184_s1 }
 0x134   :  { %p131_p1 = pnand %p129_p0, %p126_p13 }
 0x136   :  { %134 = shalt.err (!%p131_p1)
}
 0x137   :  { %71 = dma.vmem_to_hbm [thread:$0]  %s66_s24, 256, %s184_s1, [#allocation4], %s140_s16, %s140_s16, %s141_s17  }
 0x138   :  { %137 = dma.done.wait [#allocation4], 256  }
 0x139   :  { %138 = vsyncadd [#allocation4], 4294967040 }
 0x13a   :  { %75 = vsyncpa [#allocation3], 1 }
 0x13b   :  { %76 = vsyncpa [#allocation4], 1 }

</bundles_post_ra>
